<compile_context>
chip_gen: v7x
topology: tpu7x:2x2x1
jax: 0.10.0
libtpu: 0.0.40
codegen_flags: <defaults>
</compile_context>

<pallas_src>
import functools
import math

import jax
import jax.numpy as jnp
from jax import lax
from jax.experimental import pallas as pl
from jax.experimental.pallas import tpu as pltpu


def _round_up(n, m):
    return ((n + m - 1) // m) * m


def mdn_fused_kernel(x_ref, w_ref, b_ref, pi_ref, sigma_ref, mu_ref, *,
                     num_gaussians, num_sigma_mu, head_stride):
    """One grid step: (tb, D) @ (D, 3*HS) + b, then per-head epilogue stores.

    Fused-weight lane layout (HS = head_stride, a multiple of 128):
      lanes [0, G)            pi logits        -> masked softmax -> pi_ref
      lanes [HS, HS+G*O)      sigma logits     -> exp            -> sigma_ref
      lanes [2HS, 2HS+G*O)    mu               -> identity       -> mu_ref
    All other lanes are zero padding and are never stored.
    """
    G, GO, HS = num_gaussians, num_sigma_mu, head_stride

    # Single fused MXU push (f32 accumulate); bias broadcast over sublanes.
    y = (jnp.dot(x_ref[...], w_ref[...], preferred_element_type=jnp.float32)
         + b_ref[...])

    # --- pi head: masked softmax over its 128-lane-aligned slab -------------
    y_pi = y[:, :HS]                                       # vreg-aligned slice
    col = lax.broadcasted_iota(jnp.int32, y_pi.shape, 1)
    pi_mask = col < G
    z = jnp.where(pi_mask, y_pi, -jnp.inf)
    m = jnp.max(z, axis=1, keepdims=True)
    e = jnp.exp(z - m)                                     # 0 in padded lanes
    denom = jnp.sum(e, axis=1, keepdims=True)
    inv = pl.reciprocal(denom, approx=True)                # EUP slot
    inv = inv * (2.0 - denom * inv)                        # Newton -> ~f32 exact
    pi_ref[...] = (e * inv)[:, :G].astype(pi_ref.dtype)

    # --- sigma head: exp only over its own lanes -----------------------------
    sigma_ref[...] = jnp.exp(y[:, HS:HS + GO]).astype(sigma_ref.dtype)

    # --- mu head: identity ----------------------------------------------------
    mu_ref[...] = y[:, 2 * HS:2 * HS + GO].astype(mu_ref.dtype)


def fuse_mdn_params(params):
    """Pack the three heads into one weight/bias with 128-lane-aligned heads."""
    w_pi, b_pi, w_sigma, b_sigma, w_mu, b_mu = params
    D, G = w_pi.shape
    GO = w_sigma.shape[1]
    hs = _round_up(max(G, GO, 128), 128)

    w = jnp.zeros((D, 3 * hs), jnp.float32)
    w = w.at[:, :G].set(w_pi)
    w = w.at[:, hs:hs + GO].set(w_sigma)
    w = w.at[:, 2 * hs:2 * hs + GO].set(w_mu)

    b = jnp.zeros((1, 3 * hs), jnp.float32)
    b = b.at[:, :G].set(b_pi)
    b = b.at[:, hs:hs + GO].set(b_sigma)
    b = b.at[:, 2 * hs:2 * hs + GO].set(b_mu)
    return w, b, hs


def _choose_batch_tile(B, tile_b):
    """Batch tile: multiple of 8; >=2 grid steps when there is enough work so
    the "parallel" batch axis lands on both of v7x's TensorCores."""
    if B <= 8:
        return B                      # one block spanning the (tiny) batch
    half = _round_up(pl.cdiv(B, 2), 8)
    return max(8, min(tile_b, half))


def mdn_forward(x, w_fused, b_fused, num_gaussians, out_features, *,
                tile_b=2048, use_bf16=False, out_dtype=jnp.float32):
    """MDN forward pass. Returns (pi, sigma, mu) with PyTorch-matching shapes."""
    B, D = x.shape
    G, O = num_gaussians, out_features
    GO = G * O
    HS = w_fused.shape[1] // 3
    assert w_fused.shape == (D, 3 * HS) and G <= HS and GO <= HS

    tb = _choose_batch_tile(B, tile_b)
    grid = (pl.cdiv(B, tb),)          # ragged last tile handled by Pallas

    if use_bf16:
        # Halve x/W HBM traffic; MXU accumulates in f32, epilogue stays f32.
        x_in = x.astype(jnp.bfloat16)
        w_in = w_fused.astype(jnp.bfloat16)
    else:
        x_in, w_in = x, w_fused

    kernel = functools.partial(mdn_fused_kernel, num_gaussians=G,
                               num_sigma_mu=GO, head_stride=HS)

    pi, sigma_flat, mu_flat = pl.pallas_call(
        kernel,
        out_shape=(jax.ShapeDtypeStruct((B, G), out_dtype),
                   jax.ShapeDtypeStruct((B, GO), out_dtype),
                   jax.ShapeDtypeStruct((B, GO), out_dtype)),
        grid=grid,
        in_specs=[
            pl.BlockSpec((tb, D), lambda i: (i, 0)),        # x: batch-tiled
            pl.BlockSpec((D, 3 * HS), lambda i: (0, 0)),    # W: VMEM-resident
            pl.BlockSpec((1, 3 * HS), lambda i: (0, 0)),    # b: VMEM-resident
        ],
        out_specs=(
            pl.BlockSpec((tb, G), lambda i: (i, 0)),        # pi
            pl.BlockSpec((tb, GO), lambda i: (i, 0)),       # sigma (flat)
            pl.BlockSpec((tb, GO), lambda i: (i, 0)),       # mu (flat)
        ),
        compiler_params=pltpu.CompilerParams(
            dimension_semantics=("parallel",),              # v7x: both TCs
            vmem_limit_bytes=32 * 1024 * 1024),             # lift v5e default
    )(x_in, w_in, b_fused)

    # Row-major reshape only (same HBM layout -> no copy), no slicing pass.
    sigma = sigma_flat.reshape(B, G, O)
    mu = mu_flat.reshape(B, G, O)
    return pi, sigma, mu


def init_mdn_params(key, in_features, out_features, num_gaussians):
    """nn.Linear-style init (uniform +-1/sqrt(fan_in)); weights stored as
    (in_features, out_dim), i.e. pre-transposed."""
    bound = 1.0 / math.sqrt(in_features)
    keys = jax.random.split(key, 6)

    def u(k, shape):
        return jax.random.uniform(k, shape, jnp.float32, -bound, bound)

    G, O = num_gaussians, out_features
    return (u(keys[0], (in_features, G)), u(keys[1], (1, G)),
            u(keys[2], (in_features, G * O)), u(keys[3], (1, G * O)),
            u(keys[4], (in_features, G * O)), u(keys[5], (1, G * O)))


def _reference(x, params, G, O):
    w_pi, b_pi, w_sigma, b_sigma, w_mu, b_mu = params
    B = x.shape[0]
    pi = jax.nn.softmax(x @ w_pi + b_pi, axis=1)
    sigma = jnp.exp(x @ w_sigma + b_sigma).reshape(B, G, O)
    mu = (x @ w_mu + b_mu).reshape(B, G, O)
    return pi, sigma, mu


if __name__ == "__main__":
    in_features, out_features, num_gaussians = 32, 4, 5
    key = jax.random.PRNGKey(0)
    k_x, k_p, k_x2, k_x3 = jax.random.split(key, 4)
    params = init_mdn_params(k_p, in_features, out_features, num_gaussians)
    w_fused, b_fused, _ = fuse_mdn_params(params)

    # -- small batch, single grid step ---------------------------------------
    B = 8
    x = jax.random.normal(k_x, (B, in_features), jnp.float32)
    pi, sigma, mu = mdn_forward(x, w_fused, b_fused, num_gaussians,
                                out_features)
    jax.block_until_ready((pi, sigma, mu))
    pi_r, sigma_r, mu_r = _reference(x, params, num_gaussians, out_features)
    assert pi.shape == (B, num_gaussians)
    assert sigma.shape == (B, num_gaussians, out_features)
    assert mu.shape == (B, num_gaussians, out_features)
    assert jnp.allclose(pi, pi_r, atol=1e-5)
    assert jnp.allclose(sigma, sigma_r, atol=1e-5)
    assert jnp.allclose(mu, mu_r, atol=1e-5)

    # -- tiny odd batch (block == full array dims path) ----------------------
    B3 = 3
    x3 = jax.random.normal(k_x3, (B3, in_features), jnp.float32)
    pi3, sigma3, mu3 = mdn_forward(x3, w_fused, b_fused, num_gaussians,
                                   out_features)
    jax.block_until_ready((pi3, sigma3, mu3))
    pi3_r, sigma3_r, mu3_r = _reference(x3, params, num_gaussians,
                                        out_features)
    assert jnp.allclose(pi3, pi3_r, atol=1e-5)
    assert jnp.allclose(sigma3, sigma3_r, atol=1e-5)
    assert jnp.allclose(mu3, mu3_r, atol=1e-5)

    # -- larger ragged batch, default tile: 2 grid steps + masked last tile --
    B2 = 300
    x2 = jax.random.normal(k_x2, (B2, in_features), jnp.float32)
    pi2, sigma2, mu2 = mdn_forward(x2, w_fused, b_fused, num_gaussians,
                                   out_features)
    jax.block_until_ready((pi2, sigma2, mu2))
    pi2_r, sigma2_r, mu2_r = _reference(x2, params, num_gaussians,
                                        out_features)
    assert jnp.allclose(pi2, pi2_r, atol=1e-5)
    assert jnp.allclose(sigma2, sigma2_r, atol=1e-5)
    assert jnp.allclose(mu2, mu2_r, atol=1e-5)

    # -- small tile: >2 grid steps -------------------------------------------
    pi2b, sigma2b, mu2b = mdn_forward(x2, w_fused, b_fused, num_gaussians,
                                      out_features, tile_b=128)
    jax.block_until_ready((pi2b, sigma2b, mu2b))
    assert jnp.allclose(pi2b, pi2_r, atol=1e-5)
    assert jnp.allclose(sigma2b, sigma2_r, atol=1e-5)
    assert jnp.allclose(mu2b, mu2_r, atol=1e-5)

    # -- opt-in bf16 input path (f32 accumulate), looser tolerance -----------
    pi4, sigma4, mu4 = mdn_forward(x2, w_fused, b_fused, num_gaussians,
                                   out_features, use_bf16=True)
    jax.block_until_ready((pi4, sigma4, mu4))
    assert jnp.allclose(pi4, pi2_r, rtol=5e-2, atol=5e-2)
    assert jnp.allclose(sigma4, sigma2_r, rtol=5e-2, atol=5e-2)
    assert jnp.allclose(mu4, mu2_r, rtol=5e-2, atol=5e-2)

    print("KERNEL_OK")
</pallas_src>

<mosaic_0001>
module attributes {stable_mosaic.version = 11 : i64} {
  func.func @mdn_fused_kernel(%arg0: i32, %arg1: memref<8x32xf32, #tpu.memory_space<vmem>>, %arg2: memref<32x384xf32, #tpu.memory_space<vmem>>, %arg3: memref<1x384xf32, #tpu.memory_space<vmem>>, %arg4: memref<8x5xf32, #tpu.memory_space<vmem>>, %arg5: memref<8x20xf32, #tpu.memory_space<vmem>>, %arg6: memref<8x20xf32, #tpu.memory_space<vmem>>) attributes {dimension_semantics = [#tpu.dimension_semantics<parallel>], iteration_bounds = array<i64: 1>, scalar_prefetch = 0 : i64, scratch_operands = 0 : i64, tpu.core_type = #tpu.core_type<tc>, window_params = [{transform_indices = @transform_0, window_bounds = array<i64: 8, 32>}, {pipeline_mode = #tpu.pipeline_mode<synchronous>, transform_indices = @transform_1, window_bounds = array<i64: 32, 384>}, {pipeline_mode = #tpu.pipeline_mode<synchronous>, transform_indices = @transform_2, window_bounds = array<i64: 1, 384>}, {transform_indices = @transform_3, window_bounds = array<i64: 8, 5>}, {transform_indices = @transform_4, window_bounds = array<i64: 8, 20>}, {transform_indices = @transform_5, window_bounds = array<i64: 8, 20>}]} {
    %c0 = arith.constant 0 : index
    %c0_0 = arith.constant 0 : index
    %0 = vector.load %arg1[%c0, %c0_0] : memref<8x32xf32, #tpu.memory_space<vmem>>, vector<8x32xf32>
    %c0_1 = arith.constant 0 : index
    %c0_2 = arith.constant 0 : index
    %1 = vector.load %arg2[%c0_1, %c0_2] : memref<32x384xf32, #tpu.memory_space<vmem>>, vector<32x384xf32>
    %cst = arith.constant dense<0.000000e+00> : vector<8x384xf32>
    %2 = tpu.matmul %0, %1, %cst {dimension_numbers = #tpu.dot_dimension_numbers<[1], [0], [0], [1], [0, 0, 1, 1], [], []>} : vector<8x32xf32>, vector<32x384xf32>, vector<8x384xf32> -> vector<8x384xf32>
    %c0_3 = arith.constant 0 : index
    %c0_4 = arith.constant 0 : index
    %3 = vector.load %arg3[%c0_3, %c0_4] : memref<1x384xf32, #tpu.memory_space<vmem>>, vector<1x384xf32>
    %4 = vector.broadcast %3 : vector<1x384xf32> to vector<8x384xf32>
    %5 = arith.addf %2, %4 : vector<8x384xf32>
    %6 = vector.extract_strided_slice %5 {offsets = [0, 0], sizes = [8, 128], strides = [1, 1]} : vector<8x384xf32> to vector<8x128xf32>
    %7 = tpu.iota {dimensions = array<i32: 1>} : vector<8x128xi32>
    %c5_i32 = arith.constant 5 : i32
    %8 = vector.broadcast %c5_i32 : i32 to vector<8x128xi32>
    %9 = arith.cmpi slt, %7, %8 : vector<8x128xi32>
    %cst_5 = arith.constant 0xFF800000 : f32
    %10 = vector.broadcast %cst_5 : f32 to vector<8x128xf32>
    %11 = arith.select %9, %6, %10 : vector<8x128xi1>, vector<8x128xf32>
    %cst_6 = arith.constant dense<0xFF800000> : vector<8xf32>
    %12 = vector.multi_reduction <maximumf>, %11, %cst_6 [1] : vector<8x128xf32> to vector<8xf32>
    %13 = vector.shape_cast %12 : vector<8xf32> to vector<8x1xf32>
    %14 = vector.broadcast %13 : vector<8x1xf32> to vector<8x128xf32>
    %15 = arith.subf %11, %14 : vector<8x128xf32>
    %16 = math.exp %15 : vector<8x128xf32>
    %cst_7 = arith.constant dense<0.000000e+00> : vector<8xf32>
    %17 = vector.multi_reduction <add>, %16, %cst_7 [1] : vector<8x128xf32> to vector<8xf32>
    %18 = vector.shape_cast %17 : vector<8xf32> to vector<8x1xf32>
    %19 = tpu.reciprocal %18 {approx = true} : vector<8x1xf32> -> vector<8x1xf32>
    %20 = arith.mulf %18, %19 : vector<8x1xf32>
    %cst_8 = arith.constant 2.000000e+00 : f32
    %21 = vector.broadcast %cst_8 : f32 to vector<8x1xf32>
    %22 = arith.subf %21, %20 : vector<8x1xf32>
    %23 = arith.mulf %19, %22 : vector<8x1xf32>
    %24 = vector.broadcast %23 : vector<8x1xf32> to vector<8x128xf32>
    %25 = arith.mulf %16, %24 : vector<8x128xf32>
    %26 = vector.extract_strided_slice %25 {offsets = [0, 0], sizes = [8, 5], strides = [1, 1]} : vector<8x128xf32> to vector<8x5xf32>
    %c0_9 = arith.constant 0 : index
    %c0_10 = arith.constant 0 : index
    %27 = vector.load %arg4[%c0_9, %c0_10] : memref<8x5xf32, #tpu.memory_space<vmem>>, vector<8x5xf32>
    tpu.vector_store %arg4[%c0_9, %c0_10], %26 {strides = array<i32>} : memref<8x5xf32, #tpu.memory_space<vmem>>, vector<8x5xf32>,
    %28 = vector.extract_strided_slice %5 {offsets = [0, 128], sizes = [8, 20], strides = [1, 1]} : vector<8x384xf32> to vector<8x20xf32>
    %29 = math.exp %28 : vector<8x20xf32>
    %c0_11 = arith.constant 0 : index
    %c0_12 = arith.constant 0 : index
    %30 = vector.load %arg5[%c0_11, %c0_12] : memref<8x20xf32, #tpu.memory_space<vmem>>, vector<8x20xf32>
    tpu.vector_store %arg5[%c0_11, %c0_12], %29 {strides = array<i32>} : memref<8x20xf32, #tpu.memory_space<vmem>>, vector<8x20xf32>,
    %31 = vector.extract_strided_slice %5 {offsets = [0, 256], sizes = [8, 20], strides = [1, 1]} : vector<8x384xf32> to vector<8x20xf32>
    %c0_13 = arith.constant 0 : index
    %c0_14 = arith.constant 0 : index
    %32 = vector.load %arg6[%c0_13, %c0_14] : memref<8x20xf32, #tpu.memory_space<vmem>>, vector<8x20xf32>
    tpu.vector_store %arg6[%c0_13, %c0_14], %31 {strides = array<i32>} : memref<8x20xf32, #tpu.memory_space<vmem>>, vector<8x20xf32>,
    return
  }
  func.func @transform_0(%arg0: i32) -> (i32, i32) {
    %c0_i32 = arith.constant 0 : i32
    %c0_i32_0 = arith.constant 0 : i32
    return %arg0, %c0_i32 : i32, i32
  }
  func.func @transform_1(%arg0: i32) -> (i32, i32) {
    %c0_i32 = arith.constant 0 : i32
    %c0_i32_0 = arith.constant 0 : i32
    %c0_i32_1 = arith.constant 0 : i32
    return %c0_i32, %c0_i32_0 : i32, i32
  }
  func.func @transform_2(%arg0: i32) -> (i32, i32) {
    %c0_i32 = arith.constant 0 : i32
    %c0_i32_0 = arith.constant 0 : i32
    %c0_i32_1 = arith.constant 0 : i32
    return %c0_i32, %c0_i32_0 : i32, i32
  }
  func.func @transform_3(%arg0: i32) -> (i32, i32) {
    %c0_i32 = arith.constant 0 : i32
    %c0_i32_0 = arith.constant 0 : i32
    return %arg0, %c0_i32 : i32, i32
  }
  func.func @transform_4(%arg0: i32) -> (i32, i32) {
    %c0_i32 = arith.constant 0 : i32
    %c0_i32_0 = arith.constant 0 : i32
    return %arg0, %c0_i32 : i32, i32
  }
  func.func @transform_5(%arg0: i32) -> (i32, i32) {
    %c0_i32 = arith.constant 0 : i32
    %c0_i32_0 = arith.constant 0 : i32
    return %arg0, %c0_i32 : i32, i32
  }
}

</mosaic_0001>

<bundles_post_ra>
// kernel: tpu_custom_call.1
= control target key start
LH: loop header
LB: loop body
LE: loop exit
PB: predicated region body
PF: predicated region fallthrough
CT: control target
= control target key end

     0   :  { %11 = vsyncpa [#allocation3], 0  ;;  %s564_s0 = inlined_call_operand.hbm [shape: f32[8,32], index: 0, kind: input, shape index: {}]   ;;  %s565_s1 = inlined_call_operand.hbm [shape: f32[32,384], index: 1, kind: input, shape index: {}]   ;;  %s566_s2 = inlined_call_operand.vmem [shape: f32[1,384], index: 2, kind: input, shape index: {}]   ;;  %s567_s3 = inlined_call_operand.hbm [shape: f32[8,5], index: 3, kind: output, shape index: {0}]   ;;  %s568_s4 = inlined_call_operand.hbm [shape: f32[8,20], index: 4, kind: output, shape index: {1}]   ;;  %s569_s5 = inlined_call_operand.hbm [shape: f32[8,20], index: 5, kind: output, shape index: {2}]  }
   0x1   :  { %12 = vsyncpa [#allocation6], 0 }
   0x2   :  { %13 = vsyncpa [#allocation4], 0 }
   0x3   :  { %14 = vsyncpa [#allocation9], 0  ;;  %s452_s18 = smov [#allocation2]   ;;  %s453_s20 = smov [#allocation5]  }
   0x4   :  { %s21_s19 = sshll.u32 %s452_s18, 4  ;;  %s30_s21 = sshll.u32 %s453_s20, 4  ;;  %s22_s19 = int_to_ptr.vmem [resolvable:$true] %s21_s19  ;;  %s492_s21 = int_to_ptr.vmem [resolvable:$true] %s30_s21 }
   0x5   :  { %s334_s24 = scalar_lea.hbm %s564_s0, 128 }
   0x6   :  { %p335_p0 = scmp.ne.s32.totalorder %s564_s0, %s334_s24  ;;  %p338_p1 = scmp.lt.u32.totalorder %s334_s24, %s564_s0 }
   0x8   :  { %p340_p2 = pnand %p338_p1, %p335_p0 }
   0xa   :  { %343 = shalt.err (!%p340_p2)
}
   0xb   :  { %s344_s29 = scalar_lea.vmem %s22_s19, 128  ;;  %p349_p4 = scmp.lt.s32.totalorder %s22_s19, %s22_s19 }
   0xc   :  { %p345_p3 = scmp.ne.s32.totalorder %s22_s19, %s344_s29  ;;  %p350_p5 = scmp.lt.s32.totalorder %s344_s29, %s344_s29 }
   0xe   :  { %p351_p6 = por %p350_p5, %p349_p4 }
  0x10   :  { %p352_p7 = pnand %p351_p6, %p345_p3 }
  0x12   :  { %355 = shalt.err (!%p352_p7)
}
  0x13   :  { %24 = dma.hbm_to_vmem [thread:$0]  %s564_s0, 128, %s22_s19, [#allocation3]  }
  0x14   :  { %s356_s9 = scalar_lea.hbm %s565_s1, 1536 }
  0x15   :  { %p357_p8 = scmp.ne.s32.totalorder %s565_s1, %s356_s9  ;;  %p360_p9 = scmp.lt.u32.totalorder %s356_s9, %s565_s1 }
  0x17   :  { %p362_p10 = pnand %p360_p9, %p357_p8 }
  0x19   :  { %365 = shalt.err (!%p362_p10)
}
  0x1a   :  { %s366_s14 = scalar_lea.vmem %s492_s21, 1536  ;;  %p371_p12 = scmp.lt.s32.totalorder %s492_s21, %s492_s21 }
  0x1b   :  { %p367_p11 = scmp.ne.s32.totalorder %s492_s21, %s366_s14  ;;  %p372_p13 = scmp.lt.s32.totalorder %s366_s14, %s366_s14 }
  0x1d   :  { %p373_p0 = por %p372_p13, %p371_p12 }
  0x1f   :  { %p374_p1 = pnand %p373_p0, %p367_p11 }
  0x21   :  { %377 = shalt.err (!%p374_p1)
}
  0x22   :  { %s454_s0 = smov 384   ;;  %s455_s15 = smov 24  }
  0x23   :  { %36 = dma.hbm_to_vmem [thread:$0]  %s565_s1, 1536, %s492_s21, [#allocation6], %s454_s0, %s454_s0, %s455_s15  }
  0x24   :  { %444 = dma.done.wait [#allocation3], 128  }
  0x25   :  { %445 = vsyncadd [#allocation3], 4294967168 }
  0x26   :  { %446 = dma.done.wait [#allocation6], 1536  }
  0x27   :  { %447 = vsyncadd [#allocation6], 4294965760  ;;  %v456_v0 = vmov 0.0   ;;  %v47_v1 = vld [vmem:[#allocation5 + $0x8] sm:$0xff]  ;;  %v50_v2 = vld [vmem:[#allocation5 + $0x20] sm:$0xff]  ;;  %vm75_vm0 = vcmask 261120   ;;  %v60_v21 = vlaneseq }
  0x28   :  { %143 = vmatprep.mubr.f32.mxu0 %v456_v0  ;;  %v46_v3 = vld [vmem:[#allocation5] sm:$0xff]  ;;  %v304_v4 = vpack.c.bf16 %v50_v2, %v47_v1  ;;  %v49_v5 = vld [vmem:[#allocation5 + $0x18] sm:$0xff]  ;;  %v56_v7 = vld [vmem:[#allocation5 + $0x50] sm:$0xff]  ;;  %v457_v17 = vmov 0.0|0.0   ;;  %vm458_vm1 = vmmov 0   ;;  %vm240_vm3 = vcmask 162816  }
  0x29   :  { %v53_v6 = vld [vmem:[#allocation5 + $0x38] sm:$0xff]  ;;  %v306_v8 = vpack.c.bf16 %v49_v5, %v46_v3  ;;  %v52_v10 = vld [vmem:[#allocation5 + $0x30] sm:$0xff]  ;;  %v55_v11 = vld [vmem:[#allocation5 + $0x48] sm:$0xff]  ;;  %312 = vmatprep.subr.bf16.mxu1 %v457_v17  ;;  %301 = vmatprep.mubr.msk.f32.mxu1 %vm458_vm1, %v456_v0  ;;  %v61_v22 = vshrl.u32 %v60_v21, 7  ;;  %v221_v26 = vand.u32 127, %v60_v21 }
  0x2a   :  { %v308_v9 = vpack.c.bf16 %v56_v7, %v53_v6  ;;  %305 = vmatprep.subr.bf16.mxu0 %v304_v4  ;;  %v310_v12 = vpack.c.bf16 %v55_v11, %v52_v10  ;;  %v45_v13 = vld [vmem:[#allocation2] sm:$0xff]  ;;  %v48_v14 = vld [vmem:[#allocation5 + $0x10] sm:$0xff]  ;;  %v51_v15 = vld [vmem:[#allocation5 + $0x28] sm:$0xff] }
  0x2b   :  { %307 = vmatpush1.bf16.msra.mxu0 %v306_v8  ;;  %v54_v16 = vld [vmem:[#allocation5 + $0x40] sm:$0xff]  ;;  %v313_v18 = vpack.c.bf16 %v51_v15, %v48_v14  ;;  %v57_v19 = vld [vmem:[#allocation5 + $0x58] sm:$0xff]  ;;  %v62_v23 = vsub.s32 0, %v61_v22  ;;  %v66_v25 = vsub.s32 1, %v61_v22  ;;  %vm222_vm2 = vcmp.lt.s32.totalorder %v221_v26, 5 }
  0x2c   :  { %309 = vmatprep.subr.bf16.mxu0 %v308_v9  ;;  %v316_v20 = vpack.c.bf16 %v57_v19, %v54_v16  ;;  %v58_v24 = vld [vmem:[%s566_s2] sm:$0x7]  ;;  %v70_v40 = vsub.s32 2, %v61_v22  ;;  %s459_s2 = smov [#allocation8]  }
  0x2d   :  { %314 = vmatpush3.bf16.msra.mxu1 %v313_v18  ;;  %v63_v27 = vrot.slane %v58_v24, %v62_v23  ;;  %v67_v28 = vrot.slane %v58_v24, %v66_v25  ;;  %s259_s19 = sshll.u32 %s459_s2, 4  ;;  %s260_s19 = int_to_ptr.vmem [resolvable:$true] %s259_s19 }
  0x2e   :  { %315 = vmatprep.subr.bf16.mxu1 %v457_v17  ;;  %v71_v41 = vrot.slane %v58_v24, %v70_v40  ;;  %s378_s20 = scalar_lea.vmem %s260_s19, 128  ;;  %p383_p3 = scmp.lt.s32.totalorder %s260_s19, %s260_s19 }
  0x2f   :  { %311 = vmatpush1.bf16.msra.mxu0 %v310_v12  ;;  %p379_p2 = scmp.ne.s32.totalorder %s260_s19, %s378_s20  ;;  %p384_p4 = scmp.lt.s32.totalorder %s378_s20, %s378_s20 }
  0x31   :  { %317 = vmatpush3.bf16.msra.mxu1 %v316_v20  ;;  %p385_p5 = por %p384_p4, %p383_p3 }
  0x32   :  { %286 = vmatmul.mubr.msk.f32.vlgmr.msra.gmra.mrb[0].mxu0 %vm75_vm0, %v45_v13 }
  0x33   :  { %p386_p6 = pnand %p385_p5, %p379_p2 }
  0x34   :  { %302 = vmatmul.mubr.msk.f32.vlgmr.msra.gmra.mrb[0].mxu1 %vm75_vm0, %v45_v13 }
 0x105   :  { %v145_v29 = vpop.f32.mrb[0].mxu0 }
 0x106   :  { %v146_v30 = vadd.f32 %v145_v29, %v63_v27  ;;  %v147_v31 = vpop.f32.mrb[1].mxu0 }
 0x107   :  { %v148_v32 = vadd.f32 %v147_v31, %v67_v28  ;;  %v216_v42 = vpop.f32.mrb[0].mxu1 }
 0x108   :  { %v223_v33 = vsel %vm222_vm2, %v146_v30, -inf  ;;  %v303_v43 = vpop.f32.mrb[1].mxu1  ;;  %v217_v44 = vadd.f32 %v216_v42, %v71_v41 }
 0x109   :  { %v238_v34 = vmul.f32 1.442695, %v148_v32  ;;  %224 = vmax.xlane.f32.xlu0 %v223_v33 }
 0x10b   :  { %328 = vpow2.f32 %v238_v34 }
 0x115   :  { %v329_v35 = vpop.eup %328 }
 0x116   :  { %241 = vst.msk [vmem:[#allocation8] sm:$0xff] %vm240_vm3, %v329_v35 }
 0x196   :  { %v225_v36 = vpop.xlane.xlu0 %224 }
 0x197   :  { %v226_v37 = vsub.f32 %v223_v33, %v225_v36 }
 0x199   :  { %v227_v38 = vmul.f32 1.442695, %v226_v37 }
 0x19b   :  { %330 = vpow2.f32 %v227_v38 }
 0x1a5   :  { %v331_v39 = vpop.eup %330 }
 0x1a6   :  { %229 = vadd.xlane.f32.xlu0 %v331_v39 }
 0x1a7   :  { %389 = shalt.err (!%p386_p6)
}
 0x1a8   :  { %s390_s23 = scalar_lea.hbm %s568_s4, 128 }
 0x1a9   :  { %p391_p7 = scmp.ne.s32.totalorder %s568_s4, %s390_s23  ;;  %p394_p8 = scmp.lt.u32.totalorder %s390_s23, %s568_s4 }
 0x1ab   :  { %p396_p9 = pnand %p394_p8, %p391_p7 }
 0x1ad   :  { %399 = shalt.err (!%p396_p9)
}
 0x1ae   :  { %262 = dma.vmem_to_hbm [thread:$0]  %s260_s19, 128, %s568_s4, [#allocation9]   ;;  %242 = vst.msk [vmem:[#allocation10] sm:$0xff] %vm240_vm3, %v217_v44 }
 0x1af   :  { %s460_s30 = smov [#allocation10]  }
 0x1b0   :  { %s269_s6 = sshll.u32 %s460_s30, 4  ;;  %s270_s6 = int_to_ptr.vmem [resolvable:$true] %s269_s6 }
 0x1b1   :  { %s400_s7 = scalar_lea.vmem %s270_s6, 128  ;;  %p405_p11 = scmp.lt.s32.totalorder %s270_s6, %s270_s6 }
 0x1b2   :  { %p401_p10 = scmp.ne.s32.totalorder %s270_s6, %s400_s7  ;;  %p406_p12 = scmp.lt.s32.totalorder %s400_s7, %s400_s7 }
 0x1b4   :  { %p407_p13 = por %p406_p12, %p405_p11 }
 0x1b6   :  { %p408_p0 = pnand %p407_p13, %p401_p10 }
 0x1b8   :  { %411 = shalt.err (!%p408_p0)
}
 0x1b9   :  { %s412_s10 = scalar_lea.hbm %s569_s5, 128 }
 0x1ba   :  { %p413_p1 = scmp.ne.s32.totalorder %s569_s5, %s412_s10  ;;  %p416_p2 = scmp.lt.u32.totalorder %s412_s10, %s569_s5 }
 0x1bc   :  { %p418_p3 = pnand %p416_p2, %p413_p1 }
 0x1be   :  { %421 = shalt.err (!%p418_p3)
}
 0x1bf   :  { %272 = dma.vmem_to_hbm [thread:$0]  %s270_s6, 128, %s569_s5, [#allocation9]   ;;  %vm236_vm4 = vcmask 39936  }
 0x1c0   :  { %s461_s15 = smov [#allocation7]  }
 0x1c1   :  { %s249_s16 = sshll.u32 %s461_s15, 4  ;;  %s250_s16 = int_to_ptr.vmem [resolvable:$true] %s249_s16 }
 0x1c2   :  { %s422_s17 = scalar_lea.vmem %s250_s16, 128  ;;  %p427_p5 = scmp.lt.s32.totalorder %s250_s16, %s250_s16 }
 0x1c3   :  { %p423_p4 = scmp.ne.s32.totalorder %s250_s16, %s422_s17  ;;  %p428_p6 = scmp.lt.s32.totalorder %s422_s17, %s422_s17 }
 0x1c5   :  { %p429_p7 = por %p428_p6, %p427_p5 }
 0x1c7   :  { %p430_p8 = pnand %p429_p7, %p423_p4 }
 0x233   :  { %v230_v45 = vpop.xlane.xlu0 %229 }
 0x234   :  { %332 = vrcp.f32 %v230_v45 }
 0x23e   :  { %v333_v46 = vpop.eup %332 }
 0x23f   :  { %v232_v47 = vmul.f32 %v333_v46, %v230_v45 }
 0x241   :  { %v233_v48 = vsub.f32 2.0, %v232_v47 }
 0x243   :  { %v234_v49 = vmul.f32 %v333_v46, %v233_v48 }
 0x245   :  { %v235_v50 = vmul.f32 %v331_v39, %v234_v49 }
 0x247   :  { %237 = vst.msk [vmem:[#allocation7] sm:$0xff] %vm236_vm4, %v235_v50 }
 0x248   :  { %433 = shalt.err (!%p430_p8)
}
 0x249   :  { %s434_s18 = scalar_lea.hbm %s567_s3, 128 }
 0x24a   :  { %p435_p9 = scmp.ne.s32.totalorder %s567_s3, %s434_s18  ;;  %p438_p10 = scmp.lt.u32.totalorder %s434_s18, %s567_s3 }
 0x24c   :  { %p440_p11 = pnand %p438_p10, %p435_p9 }
 0x24e   :  { %443 = shalt.err (!%p440_p11)
}
 0x24f   :  { %252 = dma.vmem_to_hbm [thread:$0]  %s250_s16, 128, %s567_s3, [#allocation4]  }
 0x250   :  { %448 = dma.done.wait [#allocation4], 128  }
 0x251   :  { %449 = vsyncadd [#allocation4], 4294967168 }
 0x252   :  { %450 = dma.done.wait [#allocation9], 256  }
 0x253   :  { %451 = vsyncadd [#allocation9], 4294967040 }
 0x254   :  { %282 = vsyncpa [#allocation3], 1 }
 0x255   :  { %283 = vsyncpa [#allocation6], 1 }
 0x256   :  { %284 = vsyncpa [#allocation4], 1 }
 0x257   :  { %285 = vsyncpa [#allocation9], 1 }

</bundles_post_ra>
